<compile_context>
chip_gen: v7x
topology: tpu7x:2x2x1
jax: 0.10.0
libtpu: 0.0.40
codegen_flags: <defaults>
</compile_context>

<pallas_src>
import functools

import jax
import jax.numpy as jnp
from jax.experimental import pallas as pl
from jax.experimental.pallas import tpu as pltpu


def _round_up(n, m):
    return ((n + m - 1) // m) * m


# ---------------------------------------------------------------------------
# One-time parameter packing (do this ONCE; reuse the result on every call).
# ---------------------------------------------------------------------------
def pack_params(params):
    """Pack PyTorch-convention RNNAgent weights into lane-aligned slabs.

    Layout (Hp = round_up(H,128), Ap = round_up(A,128)):
      w1    (I,  Hp)     fc1 weight, pre-transposed, lane-padded
      w_ia  (Hp, 3*Hp)   GRU input->hidden, gates at lane offsets 0/Hp/2Hp (r|z|n)
      w_ha  (Hp, 3*Hp)   GRU hidden->hidden, same gate layout
      w2    (Hp, Ap)     fc2 weight, pre-transposed, padded
      b1    (1, Hp)      fc1 bias
      b_ia  (1, 3*Hp)    [ b_ir+b_hr | b_iz+b_hz | b_in ]   (folded into ga matmul)
      b_hn  (1, Hp)      hidden-side n-gate bias (must stay inside r*(...))
      b2    (1, Ap)      fc2 bias
    """
    f32 = jnp.float32
    fc1_w = jnp.asarray(params["fc1_w"], f32)
    fc2_w = jnp.asarray(params["fc2_w"], f32)
    H, I = fc1_w.shape
    A = fc2_w.shape[0]
    Hp = _round_up(H, 128)
    Ap = _round_up(A, 128)

    def pad2(m, rows, cols):
        m = jnp.asarray(m, f32)
        return jnp.zeros((rows, cols), f32).at[: m.shape[0], : m.shape[1]].set(m)

    def pad_row(v, cols):
        v = jnp.asarray(v, f32).reshape(1, -1)
        return jnp.zeros((1, cols), f32).at[:, : v.shape[1]].set(v)

    w_ih = jnp.asarray(params["gru_w_ih"], f32)   # (3H, H), gate rows [r; z; n]
    w_hh = jnp.asarray(params["gru_w_hh"], f32)

    def gate_cols(w):  # (3H, H) -> (Hp, 3*Hp) with gates at lane offsets 0/Hp/2Hp
        out = jnp.zeros((Hp, 3 * Hp), f32)
        for g in range(3):
            blk = w[g * H:(g + 1) * H, :].T            # (H, H)
            out = out.at[:H, g * Hp:g * Hp + H].set(blk)
        return out

    b_ih = jnp.asarray(params["gru_b_ih"], f32)
    b_hh = jnp.asarray(params["gru_b_hh"], f32)
    b_ia = jnp.zeros((1, 3 * Hp), f32)
    b_ia = b_ia.at[0, 0:H].set(b_ih[:H] + b_hh[:H])                     # r (pre-summed)
    b_ia = b_ia.at[0, Hp:Hp + H].set(b_ih[H:2 * H] + b_hh[H:2 * H])     # z (pre-summed)
    b_ia = b_ia.at[0, 2 * Hp:2 * Hp + H].set(b_ih[2 * H:])              # n (input side)

    return {
        "w1": pad2(fc1_w.T, I, Hp),
        "w_ia": gate_cols(w_ih),
        "w_ha": gate_cols(w_hh),
        "w2": pad2(fc2_w.T, Hp, Ap),
        "b1": pad_row(params["fc1_b"], Hp),
        "b_ia": b_ia,
        "b_hn": pad_row(b_hh[2 * H:], Hp),
        "b2": pad_row(params["fc2_b"], Ap),
        "H": H, "A": A, "Hp": Hp, "Ap": Ap,
    }


# ---------------------------------------------------------------------------
# Chunked rollout kernel: tb timesteps per grid step, h carried in vregs.
# ---------------------------------------------------------------------------
def _make_rollout_kernel(tb, bb, Hp, Ap):
    def kernel(x_ref, h0_ref, w1_ref, wia_ref, wha_ref, w2_ref,
               b1_ref, bia_ref, bhn_ref, b2_ref, q_ref, h_ref):
        ci = pl.program_id(1)  # time-chunk index (sequential, "arbitrary")

        @pl.when(ci == 0)
        def _():
            h_ref[...] = h0_ref[...]

        # Loop-invariant (per-chunk) loads.
        b1 = b1_ref[...]
        b_ia = bia_ref[...]
        b_hn = bhn_ref[...]
        b2 = b2_ref[...]

        nin = x_ref.shape[2]
        x = x_ref[...].reshape(tb * bb, nin)

        # fc1 + ReLU for the whole time chunk — off the serial recurrence chain.
        # TODO(synk): LayerNorm branch not implemented — getattr(args,
        # 'use_layer_norm ', False) uses a trailing-space key in the reference
        # module, so it is always False.
        a = jnp.maximum(
            jnp.dot(x, w1_ref[...], preferred_element_type=jnp.float32) + b1, 0.0)

        # Input-side GRU pre-activations (+ folded biases) for the whole chunk.
        ga = jnp.dot(a, wia_ref[...], preferred_element_type=jnp.float32) + b_ia

        w_ha = wha_ref[...]          # reused tb times on the serial chain
        h = h_ref[...]               # (bb, Hp) — carried in vregs below
        hs = []
        for t in range(tb):          # fully unrolled (tb is small and static)
            g_t = ga[t * bb:(t + 1) * bb, :]                        # (bb, 3*Hp)
            gh = jnp.dot(h, w_ha, preferred_element_type=jnp.float32)
            rz = jax.nn.sigmoid(g_t[:, :2 * Hp] + gh[:, :2 * Hp])   # lane-aligned
            r = rz[:, :Hp]
            z = rz[:, Hp:]
            n = jnp.tanh(g_t[:, 2 * Hp:] + r * (gh[:, 2 * Hp:] + b_hn))
            h = (1.0 - z) * n + z * h
            hs.append(h)

        h_ref[...] = h               # single hidden-state store per chunk

        # fc2 + ReLU for the whole chunk — one MXU push, lane-dense output.
        h_all = jnp.concatenate(hs, axis=0)                          # (tb*bb, Hp)
        q = jnp.maximum(
            jnp.dot(h_all, w2_ref[...], preferred_element_type=jnp.float32) + b2, 0.0)
        q_ref[...] = q.reshape(tb, bb, Ap)

    return kernel


@functools.partial(jax.jit, static_argnames=("H", "tb", "bb"))
def _rollout_impl(x_seq, h0, w1, w_ia, w_ha, w2, b1, b_ia, b_hn, b2, *, H, tb, bb):
    T, B, nin = x_seq.shape
    Hp = w1.shape[1]
    Ap = w2.shape[1]
    h0p = jnp.zeros((B, Hp), jnp.float32).at[:, :H].set(h0)

    nb = B // bb
    nc = T // tb

    def resident(shape):
        return pl.BlockSpec(shape, lambda bi, ci: (0,) * len(shape))

    grid_spec = pltpu.PrefetchScalarGridSpec(
        num_scalar_prefetch=0,
        grid=(nb, nc),
        in_specs=[
            pl.BlockSpec((tb, bb, nin), lambda bi, ci: (ci, bi, 0)),  # x chunk
            pl.BlockSpec((bb, Hp), lambda bi, ci: (bi, 0)),           # h0 (batch block)
            resident(w1.shape),                                       # weights resident
            resident(w_ia.shape),
            resident(w_ha.shape),
            resident(w2.shape),
            resident(b1.shape),
            resident(b_ia.shape),
            resident(b_hn.shape),
            resident(b2.shape),
        ],
        out_specs=(
            pl.BlockSpec((tb, bb, Ap), lambda bi, ci: (ci, bi, 0)),   # q chunk (lane-dense)
            pl.BlockSpec((bb, Hp), lambda bi, ci: (bi, 0)),           # hidden carry
        ),
    )

    q_full, h_full = pl.pallas_call(
        _make_rollout_kernel(tb, bb, Hp, Ap),
        out_shape=(jax.ShapeDtypeStruct((T, B, Ap), jnp.float32),
                   jax.ShapeDtypeStruct((B, Hp), jnp.float32)),
        grid_spec=grid_spec,
        compiler_params=pltpu.CompilerParams(
            dimension_semantics=("parallel", "arbitrary")),  # batch || , time sequential
    )(x_seq, h0p, w1, w_ia, w_ha, w2, b1, b_ia, b_hn, b2)
    return q_full, h_full


def rnn_agent_rollout(x_seq, hidden_state, packed, *, time_block=8, batch_block=None):
    """Apply RNNAgent.forward over T timesteps (x_seq: (T, B, I)).

    Returns (q_seq (T, B, A), h_final (B, H)).
    """
    H, A = packed["H"], packed["A"]
    T, B, _ = x_seq.shape

    tb = max(1, min(time_block, T))
    while T % tb:
        tb -= 1
    bb = B if batch_block is None else max(1, min(batch_block, B))
    while B % bb:
        bb -= 1
    if bb != B and bb % 8 != 0:   # sublane alignment for batch blocks
        bb = B

    q_full, h_full = _rollout_impl(
        x_seq.astype(jnp.float32),
        hidden_state.reshape(-1, H).astype(jnp.float32),
        packed["w1"], packed["w_ia"], packed["w_ha"], packed["w2"],
        packed["b1"], packed["b_ia"], packed["b_hn"], packed["b2"],
        H=H, tb=tb, bb=bb)
    return q_full[:, :, :A], h_full[:, :H]


def rnn_agent_forward(inputs, hidden_state, packed):
    """One RNNAgent.forward step (routed through the rollout path, T=1)."""
    q_seq, h_final = rnn_agent_rollout(inputs[None], hidden_state, packed,
                                       time_block=1)
    return q_seq[0], h_final


# ---------------------------------------------------------------------------
# Reference + test harness
# ---------------------------------------------------------------------------
def _init_params(key, input_shape, hidden, n_actions):
    ks = jax.random.split(key, 8)
    scale = 0.1
    return {
        "fc1_w": scale * jax.random.normal(ks[0], (hidden, input_shape), jnp.float32),
        "fc1_b": scale * jax.random.normal(ks[1], (hidden,), jnp.float32),
        "gru_w_ih": scale * jax.random.normal(ks[2], (3 * hidden, hidden), jnp.float32),
        "gru_b_ih": scale * jax.random.normal(ks[3], (3 * hidden,), jnp.float32),
        "gru_w_hh": scale * jax.random.normal(ks[4], (3 * hidden, hidden), jnp.float32),
        "gru_b_hh": scale * jax.random.normal(ks[5], (3 * hidden,), jnp.float32),
        "fc2_w": scale * jax.random.normal(ks[6], (n_actions, hidden), jnp.float32),
        "fc2_b": scale * jax.random.normal(ks[7], (n_actions,), jnp.float32),
    }


def _reference_forward(inputs, hidden_state, params):
    """Pure-JAX replica of nn.Linear / nn.GRUCell / F.relu semantics."""
    H = params["fc1_w"].shape[0]
    x = inputs @ params["fc1_w"].T + params["fc1_b"]
    x = jnp.maximum(x, 0.0)
    h = hidden_state.reshape(-1, H)
    gi = x @ params["gru_w_ih"].T + params["gru_b_ih"]
    gh = h @ params["gru_w_hh"].T + params["gru_b_hh"]
    i_r, i_z, i_n = gi[:, :H], gi[:, H:2 * H], gi[:, 2 * H:]
    h_r, h_z, h_n = gh[:, :H], gh[:, H:2 * H], gh[:, 2 * H:]
    r = jax.nn.sigmoid(i_r + h_r)
    z = jax.nn.sigmoid(i_z + h_z)
    n = jnp.tanh(i_n + r * h_n)
    h_new = (1.0 - z) * n + z * h
    q = jnp.maximum(h_new @ params["fc2_w"].T + params["fc2_b"], 0.0)
    return q, h_new


def _check_rollout(x_seq, hidden, params, q_seq, h_final):
    h_carry = hidden
    for t in range(x_seq.shape[0]):
        q_t, h_carry = _reference_forward(x_seq[t], h_carry, params)
        assert jnp.allclose(q_seq[t], q_t, atol=1e-5, rtol=1e-5)
    assert jnp.allclose(h_final, h_carry, atol=1e-5, rtol=1e-5)


if __name__ == "__main__":
    key = jax.random.PRNGKey(0)
    k_in, k_h, k_seq, k_p, k_h2, k_seq2 = jax.random.split(key, 6)

    batch = 8
    input_shape = 24
    rnn_hidden_dim = 32
    n_actions = 8
    T = 4

    params = _init_params(k_p, input_shape, rnn_hidden_dim, n_actions)
    packed = pack_params(params)          # ONE-TIME packing, reused across calls

    # ---- single forward step (matches RNNAgent.forward) ----
    inputs = jax.random.normal(k_in, (batch, input_shape), jnp.float32)
    hidden = jax.random.normal(k_h, (batch, rnn_hidden_dim), jnp.float32)
    q, h_out = rnn_agent_forward(inputs, hidden, packed)
    jax.block_until_ready((q, h_out))

    q_ref, h_ref = _reference_forward(inputs, hidden, params)
    assert q.shape == (batch, n_actions) and h_out.shape == (batch, rnn_hidden_dim)
    assert jnp.allclose(q, q_ref, atol=1e-5, rtol=1e-5)
    assert jnp.allclose(h_out, h_ref, atol=1e-5, rtol=1e-5)

    # ---- T-step rollout: single time chunk, fully unrolled in-kernel ----
    x_seq = jax.random.normal(k_seq, (T, batch, input_shape), jnp.float32)
    q_seq, h_final = rnn_agent_rollout(x_seq, hidden, packed)
    jax.block_until_ready((q_seq, h_final))
    _check_rollout(x_seq, hidden, params, q_seq, h_final)

    # ---- longer rollout exercising both grid axes: batch-parallel x time-chunks ----
    T2, B2 = 16, 16
    x_seq2 = jax.random.normal(k_seq2, (T2, B2, input_shape), jnp.float32)
    hidden2 = jax.random.normal(k_h2, (B2, rnn_hidden_dim), jnp.float32)
    q_seq2, h_final2 = rnn_agent_rollout(x_seq2, hidden2, packed,
                                         time_block=8, batch_block=8)
    jax.block_until_ready((q_seq2, h_final2))
    _check_rollout(x_seq2, hidden2, params, q_seq2, h_final2)

    print("KERNEL_OK")
</pallas_src>

<mosaic_0001>
module attributes {stable_mosaic.version = 11 : i64} {
  func.func @kernel(%arg0: i32, %arg1: i32, %arg2: memref<1x8x24xf32, #tpu.memory_space<vmem>>, %arg3: memref<8x128xf32, #tpu.memory_space<vmem>>, %arg4: memref<24x128xf32, #tpu.memory_space<vmem>>, %arg5: memref<128x384xf32, #tpu.memory_space<vmem>>, %arg6: memref<128x384xf32, #tpu.memory_space<vmem>>, %arg7: memref<128x128xf32, #tpu.memory_space<vmem>>, %arg8: memref<1x128xf32, #tpu.memory_space<vmem>>, %arg9: memref<1x384xf32, #tpu.memory_space<vmem>>, %arg10: memref<1x128xf32, #tpu.memory_space<vmem>>, %arg11: memref<1x128xf32, #tpu.memory_space<vmem>>, %arg12: memref<1x8x128xf32, #tpu.memory_space<vmem>>, %arg13: memref<8x128xf32, #tpu.memory_space<vmem>>) attributes {dimension_semantics = [#tpu.dimension_semantics<parallel>, #tpu.dimension_semantics<arbitrary>], iteration_bounds = array<i64: 1, 1>, scalar_prefetch = 0 : i64, scratch_operands = 0 : i64, tpu.core_type = #tpu.core_type<tc>, window_params = [{transform_indices = @transform_0, window_bounds = array<i64: 1, 8, 24>}, {transform_indices = @transform_1, window_bounds = array<i64: 8, 128>}, {pipeline_mode = #tpu.pipeline_mode<synchronous>, transform_indices = @transform_2, window_bounds = array<i64: 24, 128>}, {pipeline_mode = #tpu.pipeline_mode<synchronous>, transform_indices = @transform_3, window_bounds = array<i64: 128, 384>}, {pipeline_mode = #tpu.pipeline_mode<synchronous>, transform_indices = @transform_4, window_bounds = array<i64: 128, 384>}, {pipeline_mode = #tpu.pipeline_mode<synchronous>, transform_indices = @transform_5, window_bounds = array<i64: 128, 128>}, {pipeline_mode = #tpu.pipeline_mode<synchronous>, transform_indices = @transform_6, window_bounds = array<i64: 1, 128>}, {pipeline_mode = #tpu.pipeline_mode<synchronous>, transform_indices = @transform_7, window_bounds = array<i64: 1, 384>}, {pipeline_mode = #tpu.pipeline_mode<synchronous>, transform_indices = @transform_8, window_bounds = array<i64: 1, 128>}, {pipeline_mode = #tpu.pipeline_mode<synchronous>, transform_indices = @transform_9, window_bounds = array<i64: 1, 128>}, {transform_indices = @transform_10, window_bounds = array<i64: 1, 8, 128>}, {transform_indices = @transform_11, window_bounds = array<i64: 8, 128>}]} {
    %c0_i32 = arith.constant 0 : i32
    %0 = arith.cmpi eq, %arg1, %c0_i32 : i32
    %1 = arith.extui %0 : i1 to i32
    %c0_i32_0 = arith.constant 0 : i32
    %2 = arith.cmpi ne, %1, %c0_i32_0 : i32
    scf.if %2 {
      %c0_33 = arith.constant 0 : index
      %c0_34 = arith.constant 0 : index
      %53 = vector.load %arg3[%c0_33, %c0_34] : memref<8x128xf32, #tpu.memory_space<vmem>>, vector<8x128xf32>
      %c0_35 = arith.constant 0 : index
      %c0_36 = arith.constant 0 : index
      %54 = vector.load %arg13[%c0_35, %c0_36] : memref<8x128xf32, #tpu.memory_space<vmem>>, vector<8x128xf32>
      tpu.vector_store %arg13[%c0_35, %c0_36], %53 {strides = array<i32>} : memref<8x128xf32, #tpu.memory_space<vmem>>, vector<8x128xf32>,
    } else {
    }
    %c0 = arith.constant 0 : index
    %c0_1 = arith.constant 0 : index
    %3 = vector.load %arg8[%c0, %c0_1] : memref<1x128xf32, #tpu.memory_space<vmem>>, vector<1x128xf32>
    %c0_2 = arith.constant 0 : index
    %c0_3 = arith.constant 0 : index
    %4 = vector.load %arg9[%c0_2, %c0_3] : memref<1x384xf32, #tpu.memory_space<vmem>>, vector<1x384xf32>
    %c0_4 = arith.constant 0 : index
    %c0_5 = arith.constant 0 : index
    %5 = vector.load %arg10[%c0_4, %c0_5] : memref<1x128xf32, #tpu.memory_space<vmem>>, vector<1x128xf32>
    %c0_6 = arith.constant 0 : index
    %c0_7 = arith.constant 0 : index
    %6 = vector.load %arg11[%c0_6, %c0_7] : memref<1x128xf32, #tpu.memory_space<vmem>>, vector<1x128xf32>
    %c0_8 = arith.constant 0 : index
    %c0_9 = arith.constant 0 : index
    %c0_10 = arith.constant 0 : index
    %7 = vector.load %arg2[%c0_8, %c0_9, %c0_10] : memref<1x8x24xf32, #tpu.memory_space<vmem>>, vector<1x8x24xf32>
    %8 = vector.shape_cast %7 : vector<1x8x24xf32> to vector<8x24xf32>
    %c0_11 = arith.constant 0 : index
    %c0_12 = arith.constant 0 : index
    %9 = vector.load %arg4[%c0_11, %c0_12] : memref<24x128xf32, #tpu.memory_space<vmem>>, vector<24x128xf32>
    %cst = arith.constant dense<0.000000e+00> : vector<8x128xf32>
    %10 = tpu.matmul %8, %9, %cst {dimension_numbers = #tpu.dot_dimension_numbers<[1], [0], [0], [1], [0, 0, 1, 1], [], []>} : vector<8x24xf32>, vector<24x128xf32>, vector<8x128xf32> -> vector<8x128xf32>
    %11 = vector.broadcast %3 : vector<1x128xf32> to vector<8x128xf32>
    %12 = arith.addf %10, %11 : vector<8x128xf32>
    %cst_13 = arith.constant 0.000000e+00 : f32
    %13 = vector.broadcast %cst_13 : f32 to vector<8x128xf32>
    %14 = arith.maximumf %12, %13 : vector<8x128xf32>
    %c0_14 = arith.constant 0 : index
    %c0_15 = arith.constant 0 : index
    %15 = vector.load %arg5[%c0_14, %c0_15] : memref<128x384xf32, #tpu.memory_space<vmem>>, vector<128x384xf32>
    %cst_16 = arith.constant dense<0.000000e+00> : vector<8x384xf32>
    %16 = tpu.matmul %14, %15, %cst_16 {dimension_numbers = #tpu.dot_dimension_numbers<[1], [0], [0], [1], [0, 0, 1, 1], [], []>} : vector<8x128xf32>, vector<128x384xf32>, vector<8x384xf32> -> vector<8x384xf32>
    %17 = vector.broadcast %4 : vector<1x384xf32> to vector<8x384xf32>
    %18 = arith.addf %16, %17 : vector<8x384xf32>
    %c0_17 = arith.constant 0 : index
    %c0_18 = arith.constant 0 : index
    %19 = vector.load %arg6[%c0_17, %c0_18] : memref<128x384xf32, #tpu.memory_space<vmem>>, vector<128x384xf32>
    %c0_19 = arith.constant 0 : index
    %c0_20 = arith.constant 0 : index
    %20 = vector.load %arg13[%c0_19, %c0_20] : memref<8x128xf32, #tpu.memory_space<vmem>>, vector<8x128xf32>
    %cst_21 = arith.constant dense<0.000000e+00> : vector<8x384xf32>
    %21 = tpu.matmul %20, %19, %cst_21 {dimension_numbers = #tpu.dot_dimension_numbers<[1], [0], [0], [1], [0, 0, 1, 1], [], []>} : vector<8x128xf32>, vector<128x384xf32>, vector<8x384xf32> -> vector<8x384xf32>
    %22 = vector.extract_strided_slice %18 {offsets = [0, 0], sizes = [8, 256], strides = [1, 1]} : vector<8x384xf32> to vector<8x256xf32>
    %23 = vector.extract_strided_slice %21 {offsets = [0, 0], sizes = [8, 256], strides = [1, 1]} : vector<8x384xf32> to vector<8x256xf32>
    %24 = arith.addf %22, %23 : vector<8x256xf32>
    %25 = arith.negf %24 : vector<8x256xf32>
    %26 = math.exp %25 : vector<8x256xf32>
    %cst_22 = arith.constant 1.000000e+00 : f32
    %27 = vector.broadcast %cst_22 : f32 to vector<8x256xf32>
    %28 = arith.addf %27, %26 : vector<8x256xf32>
    %29 = arith.divf %27, %28 : vector<8x256xf32>
    %30 = vector.extract_strided_slice %29 {offsets = [0, 0], sizes = [8, 128], strides = [1, 1]} : vector<8x256xf32> to vector<8x128xf32>
    %31 = vector.extract_strided_slice %29 {offsets = [0, 128], sizes = [8, 128], strides = [1, 1]} : vector<8x256xf32> to vector<8x128xf32>
    %32 = vector.extract_strided_slice %18 {offsets = [0, 256], sizes = [8, 128], strides = [1, 1]} : vector<8x384xf32> to vector<8x128xf32>
    %33 = vector.extract_strided_slice %21 {offsets = [0, 256], sizes = [8, 128], strides = [1, 1]} : vector<8x384xf32> to vector<8x128xf32>
    %34 = vector.broadcast %5 : vector<1x128xf32> to vector<8x128xf32>
    %35 = arith.addf %33, %34 : vector<8x128xf32>
    %36 = arith.mulf %30, %35 : vector<8x128xf32>
    %37 = arith.addf %32, %36 : vector<8x128xf32>
    %38 = math.tanh %37 : vector<8x128xf32>
    %cst_23 = arith.constant 1.000000e+00 : f32
    %39 = vector.broadcast %cst_23 : f32 to vector<8x128xf32>
    %40 = arith.subf %39, %31 : vector<8x128xf32>
    %41 = arith.mulf %40, %38 : vector<8x128xf32>
    %42 = arith.mulf %31, %20 : vector<8x128xf32>
    %43 = arith.addf %41, %42 : vector<8x128xf32>
    %c0_24 = arith.constant 0 : index
    %c0_25 = arith.constant 0 : index
    %44 = vector.load %arg13[%c0_24, %c0_25] : memref<8x128xf32, #tpu.memory_space<vmem>>, vector<8x128xf32>
    tpu.vector_store %arg13[%c0_24, %c0_25], %43 {strides = array<i32>} : memref<8x128xf32, #tpu.memory_space<vmem>>, vector<8x128xf32>,
    %c0_26 = arith.constant 0 : index
    %c0_27 = arith.constant 0 : index
    %45 = vector.load %arg7[%c0_26, %c0_27] : memref<128x128xf32, #tpu.memory_space<vmem>>, vector<128x128xf32>
    %cst_28 = arith.constant dense<0.000000e+00> : vector<8x128xf32>
    %46 = tpu.matmul %43, %45, %cst_28 {dimension_numbers = #tpu.dot_dimension_numbers<[1], [0], [0], [1], [0, 0, 1, 1], [], []>} : vector<8x128xf32>, vector<128x128xf32>, vector<8x128xf32> -> vector<8x128xf32>
    %47 = vector.broadcast %6 : vector<1x128xf32> to vector<8x128xf32>
    %48 = arith.addf %46, %47 : vector<8x128xf32>
    %cst_29 = arith.constant 0.000000e+00 : f32
    %49 = vector.broadcast %cst_29 : f32 to vector<8x128xf32>
    %50 = arith.maximumf %48, %49 : vector<8x128xf32>
    %51 = vector.shape_cast %50 : vector<8x128xf32> to vector<1x8x128xf32>
    %c0_30 = arith.constant 0 : index
    %c0_31 = arith.constant 0 : index
    %c0_32 = arith.constant 0 : index
    %52 = vector.load %arg12[%c0_30, %c0_31, %c0_32] : memref<1x8x128xf32, #tpu.memory_space<vmem>>, vector<1x8x128xf32>
    tpu.vector_store %arg12[%c0_30, %c0_31, %c0_32], %51 {strides = array<i32>} : memref<1x8x128xf32, #tpu.memory_space<vmem>>, vector<1x8x128xf32>,
    return
  }
  func.func @transform_0(%arg0: i32, %arg1: i32) -> (i32, i32, i32) {
    %c0_i32 = arith.constant 0 : i32
    %c0_i32_0 = arith.constant 0 : i32
    return %arg1, %arg0, %c0_i32 : i32, i32, i32
  }
  func.func @transform_1(%arg0: i32, %arg1: i32) -> (i32, i32) {
    %c0_i32 = arith.constant 0 : i32
    %c0_i32_0 = arith.constant 0 : i32
    return %arg0, %c0_i32 : i32, i32
  }
  func.func @transform_2(%arg0: i32, %arg1: i32) -> (i32, i32) {
    %c0_i32 = arith.constant 0 : i32
    %c0_i32_0 = arith.constant 0 : i32
    %c0_i32_1 = arith.constant 0 : i32
    return %c0_i32, %c0_i32_0 : i32, i32
  }
  func.func @transform_3(%arg0: i32, %arg1: i32) -> (i32, i32) {
    %c0_i32 = arith.constant 0 : i32
    %c0_i32_0 = arith.constant 0 : i32
    %c0_i32_1 = arith.constant 0 : i32
    return %c0_i32, %c0_i32_0 : i32, i32
  }
  func.func @transform_4(%arg0: i32, %arg1: i32) -> (i32, i32) {
    %c0_i32 = arith.constant 0 : i32
    %c0_i32_0 = arith.constant 0 : i32
    %c0_i32_1 = arith.constant 0 : i32
    return %c0_i32, %c0_i32_0 : i32, i32
  }
  func.func @transform_5(%arg0: i32, %arg1: i32) -> (i32, i32) {
    %c0_i32 = arith.constant 0 : i32
    %c0_i32_0 = arith.constant 0 : i32
    %c0_i32_1 = arith.constant 0 : i32
    return %c0_i32, %c0_i32_0 : i32, i32
  }
  func.func @transform_6(%arg0: i32, %arg1: i32) -> (i32, i32) {
    %c0_i32 = arith.constant 0 : i32
    %c0_i32_0 = arith.constant 0 : i32
    %c0_i32_1 = arith.constant 0 : i32
    return %c0_i32, %c0_i32_0 : i32, i32
  }
  func.func @transform_7(%arg0: i32, %arg1: i32) -> (i32, i32) {
    %c0_i32 = arith.constant 0 : i32
    %c0_i32_0 = arith.constant 0 : i32
    %c0_i32_1 = arith.constant 0 : i32
    return %c0_i32, %c0_i32_0 : i32, i32
  }
  func.func @transform_8(%arg0: i32, %arg1: i32) -> (i32, i32) {
    %c0_i32 = arith.constant 0 : i32
    %c0_i32_0 = arith.constant 0 : i32
    %c0_i32_1 = arith.constant 0 : i32
    return %c0_i32, %c0_i32_0 : i32, i32
  }
  func.func @transform_9(%arg0: i32, %arg1: i32) -> (i32, i32) {
    %c0_i32 = arith.constant 0 : i32
    %c0_i32_0 = arith.constant 0 : i32
    %c0_i32_1 = arith.constant 0 : i32
    return %c0_i32, %c0_i32_0 : i32, i32
  }
  func.func @transform_10(%arg0: i32, %arg1: i32) -> (i32, i32, i32) {
    %c0_i32 = arith.constant 0 : i32
    %c0_i32_0 = arith.constant 0 : i32
    return %arg1, %arg0, %c0_i32 : i32, i32, i32
  }
  func.func @transform_11(%arg0: i32, %arg1: i32) -> (i32, i32) {
    %c0_i32 = arith.constant 0 : i32
    %c0_i32_0 = arith.constant 0 : i32
    return %arg0, %c0_i32 : i32, i32
  }
}

</mosaic_0001>

<bundles_post_ra>
// kernel: _rollout_impl.1
= control target key start
LH: loop header
LB: loop body
LE: loop exit
PB: predicated region body
PF: predicated region fallthrough
CT: control target
= control target key end

     0   :  { %17 = vsyncpa [#allocation3], 0  ;;  %s1388_s0 = inlined_call_operand.vmem [shape: f32[1,8,24], index: 0, kind: input, shape index: {}]   ;;  %s1389_s1 = inlined_call_operand.vmem [shape: f32[8,128], index: 1, kind: input, shape index: {}]   ;;  %s1390_s2 = inlined_call_operand.vmem [shape: f32[24,128], index: 2, kind: input, shape index: {}]   ;;  %s1391_s3 = inlined_call_operand.hbm [shape: f32[128,384], index: 3, kind: input, shape index: {}]   ;;  %s1392_s4 = inlined_call_operand.hbm [shape: f32[128,384], index: 4, kind: input, shape index: {}]   ;;  %s1393_s5 = inlined_call_operand.hbm [shape: f32[128,128], index: 5, kind: input, shape index: {}]   ;;  %s1394_s6 = inlined_call_operand.vmem [shape: f32[1,128], index: 6, kind: input, shape index: {}]   ;;  %s1395_s7 = inlined_call_operand.vmem [shape: f32[1,384], index: 7, kind: input, shape index: {}]   ;;  %s1396_s8 = inlined_call_operand.vmem [shape: f32[1,128], index: 8, kind: input, shape index: {}]   ;;  %s1397_s9 = inlined_call_operand.vmem [shape: f32[1,128], index: 9, kind: input, shape index: {}]   ;;  %s1398_s10 = inlined_call_operand.hbm [shape: f32[1,8,128], index: 10, kind: output, shape index: {0}]   ;;  %s1399_s11 = inlined_call_operand.hbm [shape: f32[8,128], index: 11, kind: output, shape index: {1}]  }
   0x1   :  { %18 = vsyncpa [#allocation6], 0 }
   0x2   :  { %19 = vsyncpa [#allocation4], 0 }
   0x3   :  { %20 = vsyncpa [#allocation10], 0  ;;  %s1181_s17 = smov [#allocation5]   ;;  %s1182_s19 = smov [#allocation2]  }
   0x4   :  { %s44_s18 = sshll.u32 %s1181_s17, 4  ;;  %s32_s20 = sshll.u32 %s1182_s19, 4  ;;  %s45_s18 = int_to_ptr.vmem [resolvable:$true] %s44_s18  ;;  %s1253_s20 = int_to_ptr.vmem [resolvable:$true] %s32_s20 }
   0x5   :  { %s1063_s23 = scalar_lea.hbm %s1392_s4, 6144 }
   0x6   :  { %p1064_p0 = scmp.ne.s32.totalorder %s1392_s4, %s1063_s23  ;;  %p1067_p1 = scmp.lt.u32.totalorder %s1063_s23, %s1392_s4 }
   0x8   :  { %p1069_p2 = pnand %p1067_p1, %p1064_p0 }
   0xa   :  { %1072 = shalt.err (!%p1069_p2)
}
   0xb   :  { %s1073_s28 = scalar_lea.vmem %s45_s18, 6144  ;;  %p1078_p4 = scmp.lt.s32.totalorder %s45_s18, %s45_s18 }
   0xc   :  { %p1074_p3 = scmp.ne.s32.totalorder %s45_s18, %s1073_s28  ;;  %p1079_p5 = scmp.lt.s32.totalorder %s1073_s28, %s1073_s28 }
   0xe   :  { %p1080_p6 = por %p1079_p5, %p1078_p4 }
  0x10   :  { %p1081_p7 = pnand %p1080_p6, %p1074_p3 }
  0x12   :  { %1084 = shalt.err (!%p1081_p7)
}
  0x13   :  { %s1183_s29 = smov 384   ;;  %s1184_s30 = smov 24  }
  0x14   :  { %50 = dma.hbm_to_vmem [thread:$0]  %s1392_s4, 6144, %s45_s18, [#allocation6], %s1183_s29, %s1183_s29, %s1184_s30  }
  0x15   :  { %s1085_s16 = scalar_lea.hbm %s1391_s3, 6144 }
  0x16   :  { %p1086_p8 = scmp.ne.s32.totalorder %s1391_s3, %s1085_s16  ;;  %p1089_p9 = scmp.lt.u32.totalorder %s1085_s16, %s1391_s3 }
  0x18   :  { %p1091_p10 = pnand %p1089_p9, %p1086_p8 }
  0x1a   :  { %1094 = shalt.err (!%p1091_p10)
}
  0x1b   :  { %s1095_s23 = scalar_lea.vmem %s1253_s20, 6144  ;;  %p1100_p12 = scmp.lt.s32.totalorder %s1253_s20, %s1253_s20 }
  0x1c   :  { %p1096_p11 = scmp.ne.s32.totalorder %s1253_s20, %s1095_s23  ;;  %p1101_p13 = scmp.lt.s32.totalorder %s1095_s23, %s1095_s23 }
  0x1e   :  { %p1102_p0 = por %p1101_p13, %p1100_p12 }
  0x20   :  { %p1103_p1 = pnand %p1102_p0, %p1096_p11 }
  0x22   :  { %1106 = shalt.err (!%p1103_p1)
}
  0x23   :  { %38 = dma.hbm_to_vmem [thread:$0]  %s1391_s3, 6144, %s1253_s20, [#allocation3], %s1183_s29, %s1183_s29, %s1184_s30  }
  0x24   :  { %s1185_s24 = smov [#allocation7]   ;;  %s1107_s28 = scalar_lea.hbm %s1393_s5, 2048 }
  0x25   :  { %s56_s25 = sshll.u32 %s1185_s24, 4  ;;  %p1108_p2 = scmp.ne.s32.totalorder %s1393_s5, %s1107_s28  ;;  %s57_s25 = int_to_ptr.vmem [resolvable:$true] %s56_s25 }
  0x26   :  { %p1111_p3 = scmp.lt.u32.totalorder %s1107_s28, %s1393_s5 }
  0x28   :  { %p1113_p4 = pnand %p1111_p3, %p1108_p2 }
  0x2a   :  { %1116 = shalt.err (!%p1113_p4)
}
  0x2b   :  { %s1117_s16 = scalar_lea.vmem %s57_s25, 2048  ;;  %p1122_p6 = scmp.lt.s32.totalorder %s57_s25, %s57_s25 }
  0x2c   :  { %p1118_p5 = scmp.ne.s32.totalorder %s57_s25, %s1117_s16  ;;  %p1123_p7 = scmp.lt.s32.totalorder %s1117_s16, %s1117_s16 }
  0x2e   :  { %p1124_p8 = por %p1123_p7, %p1122_p6 }
  0x30   :  { %p1125_p9 = pnand %p1124_p8, %p1118_p5 }
  0x32   :  { %1128 = shalt.err (!%p1125_p9)
}
  0x33   :  { %s1186_s3 = smov 128   ;;  %s1187_s20 = smov 8  }
  0x34   :  { %62 = dma.hbm_to_vmem [thread:$0]  %s1393_s5, 2048, %s57_s25, [#allocation6], %s1186_s3, %s1186_s3, %s1187_s20  }
  0x35   :  { %1173 = dma.done.wait [#allocation3], 6144  }
  0x36   :  { %1174 = vsyncadd [#allocation3], 4294961152 }
  0x37   :  { %1175 = dma.done.wait [#allocation6], 8192  }
  0x38   :  { %1176 = vsyncadd [#allocation6], 4294959104  ;;  %v1188_v0 = vmov 0.0|0.0   ;;  %vm1189_vm0 = vmmov 0   ;;  %v1190_v1 = vmov 0.0   ;;  %v91_v2 = vld [vmem:[%s1390_s2] sm:$0xff] }
  0x39   :  { %898 = vmatprep.subr.bf16.mxu0 %v1188_v0  ;;  %790 = vmatprep.mubr.msk.f32.mxu0 %vm1189_vm0, %v1190_v1  ;;  %v92_v3 = vld [vmem:[%s1390_s2 + $0x8] sm:$0xff]  ;;  %v179_v6 = vld [vmem:[#allocation2 + $0x20] sm:$0xff]  ;;  %v93_v7 = vld [vmem:[%s1390_s2 + $0x10] sm:$0xff]  ;;  %vm100_vm1 = vcmask 195584   ;;  %s1191_s27 = smov [#allocation9]  }
  0x3a   :  { %303 = vmatprep.mubr.f32.mxu1 %v1190_v1  ;;  %v899_v4 = vpack.c.bf16 %v92_v3, %v91_v2  ;;  %v176_v5 = vld [vmem:[#allocation2 + $0x8] sm:$0xff]  ;;  %v175_v9 = vld [vmem:[#allocation2] sm:$0xff]  ;;  %v178_v10 = vld [vmem:[#allocation2 + $0x18] sm:$0xff] }
  0x3b   :  { %v901_v8 = vpack.c.bf16 %v179_v6, %v176_v5  ;;  %v177_v11 = vld [vmem:[#allocation2 + $0x10] sm:$0xff]  ;;  %v903_v12 = vpack.c.bf16 %v178_v10, %v175_v9  ;;  %v180_v13 = vld [vmem:[#allocation2 + $0x28] sm:$0xff]  ;;  %v182_v14 = vld [vmem:[#allocation2 + $0x38] sm:$0xff] }
  0x3c   :  { %900 = vmatpush3.bf16.msra.mxu0 %v899_v4  ;;  %v185_v15 = vld [vmem:[#allocation2 + $0x50] sm:$0xff]  ;;  %v90_v16 = vld [vmem:[%s1388_s0] sm:$0xff]  ;;  %v184_v19 = vld [vmem:[#allocation2 + $0x48] sm:$0xff]  ;;  %v934_v20 = vpack.c.bf16 %v180_v13, %v177_v11 }
  0x3d   :  { %788 = vmatprep.subr.mxu0 %v1190_v1  ;;  %902 = vmatprep.subr.bf16.mxu1 %v901_v8  ;;  %v905_v17 = vpack.c.bf16 %v185_v15, %v182_v14  ;;  %v181_v18 = vld [vmem:[#allocation2 + $0x30] sm:$0xff]  ;;  %v183_v22 = vld [vmem:[#allocation2 + $0x40] sm:$0xff]  ;;  %v188_v23 = vld [vmem:[#allocation2 + $0x68] sm:$0xff] }
  0x3e   :  { %904 = vmatpush1.bf16.msra.mxu1 %v903_v12  ;;  %v907_v21 = vpack.c.bf16 %v184_v19, %v181_v18  ;;  %v191_v24 = vld [vmem:[#allocation2 + $0x80] sm:$0xff]  ;;  %v186_v25 = vld [vmem:[#allocation2 + $0x58] sm:$0xff]  ;;  %v197_v30 = vld [vmem:[#allocation2 + $0xb0] sm:$0xff] }
  0x3f   :  { %906 = vmatprep.subr.bf16.mxu1 %v905_v17  ;;  %v909_v26 = vpack.c.bf16 %v191_v24, %v188_v23  ;;  %v187_v27 = vld [vmem:[#allocation2 + $0x60] sm:$0xff]  ;;  %v190_v28 = vld [vmem:[#allocation2 + $0x78] sm:$0xff]  ;;  %v937_v31 = vpack.c.bf16 %v186_v25, %v183_v22  ;;  %v189_v33 = vld [vmem:[#allocation2 + $0x70] sm:$0xff] }
  0x40   :  { %789 = vmatpush3.msra.mxu0 %v93_v7  ;;  %v194_v29 = vld [vmem:[#allocation2 + $0x98] sm:$0xff]  ;;  %v911_v32 = vpack.c.bf16 %v190_v28, %v187_v27  ;;  %v192_v34 = vld [vmem:[#allocation2 + $0x88] sm:$0xff]  ;;  %v193_v36 = vld [vmem:[#allocation2 + $0x90] sm:$0xff] }
  0x41   :  { %791 = vmatmul.mubr.msk.f32.vlgmr.msra.gmra.mrb[0].mxu0 %vm100_vm1, %v90_v16  ;;  %933 = vmatprep.subr.bf16.mxu0 %v1188_v0  ;;  %v913_v35 = vpack.c.bf16 %v197_v30, %v194_v29  ;;  %v196_v37 = vld [vmem:[#allocation2 + $0xa8] sm:$0xff]  ;;  %v203_v39 = vld [vmem:[#allocation2 + $0xe0] sm:$0xff]  ;;  %v940_v40 = vpack.c.bf16 %v192_v34, %v189_v33  ;;  %v198_v43 = vld [vmem:[#allocation2 + $0xb8] sm:$0xff] }
  0x42   :  { %935 = vmatpush3.bf16.msra.mxu0 %v934_v20  ;;  %908 = vmatpush1.bf16.msra.mxu1 %v907_v21  ;;  %v200_v38 = vld [vmem:[#allocation2 + $0xc8] sm:$0xff]  ;;  %v915_v41 = vpack.c.bf16 %v196_v37, %v193_v36  ;;  %v195_v42 = vld [vmem:[#allocation2 + $0xa0] sm:$0xff]  ;;  %v202_v46 = vld [vmem:[#allocation2 + $0xd8] sm:$0xff] }
  0x43   :  { %936 = vmatprep.subr.bf16.mxu0 %v1188_v0  ;;  %910 = vmatprep.subr.bf16.mxu1 %v909_v26  ;;  %v917_v44 = vpack.c.bf16 %v203_v39, %v200_v38  ;;  %v199_v45 = vld [vmem:[#allocation2 + $0xc0] sm:$0xff]  ;;  %v206_v47 = vld [vmem:[#allocation2 + $0xf8] sm:$0xff]  ;;  %v209_v48 = vld [vmem:[#allocation2 + $0x110] sm:$0xff]  ;;  %v943_v49 = vpack.c.bf16 %v198_v43, %v195_v42 }
  0x44   :  { %825 = vmatprep.mubr.msk.f32.mxu0 %vm1189_vm0, %v1190_v1  ;;  %v919_v50 = vpack.c.bf16 %v202_v46, %v199_v45  ;;  %v201_v51 = vld [vmem:[#allocation2 + $0xd0] sm:$0xff]  ;;  %v204_v52 = vld [vmem:[#allocation2 + $0xe8] sm:$0xff]  ;;  %v921_v53 = vpack.c.bf16 %v209_v48, %v206_v47  ;;  %v215_v57 = vld [vmem:[#allocation2 + $0x140] sm:$0xff] }
  0x45   :  { %v205_v54 = vld [vmem:[#allocation2 + $0xf0] sm:$0xff]  ;;  %v208_v55 = vld [vmem:[#allocation2 + $0x108] sm:$0xff]  ;;  %v946_v58 = vpack.c.bf16 %v204_v52, %v201_v51  ;;  %v207_v60 = vld [vmem:[#allocation2 + $0x100] sm:$0xff] }
  0x46   :  { %938 = vmatpush3.bf16.msra.mxu0 %v937_v31  ;;  %912 = vmatpush1.bf16.msra.mxu1 %v911_v32  ;;  %v212_v56 = vld [vmem:[#allocation2 + $0x128] sm:$0xff]  ;;  %v923_v59 = vpack.c.bf16 %v208_v55, %v205_v54  ;;  %v210_v61 = vld [vmem:[#allocation2 + $0x118] sm:$0xff]  ;;  %v211_v63 = vld [vmem:[#allocation2 + $0x120] sm:$0xff] }
  0x47   :  { %939 = vmatprep.subr.bf16.mxu0 %v1188_v0  ;;  %914 = vmatprep.subr.bf16.mxu1 %v913_v35  ;;  %v925_v62 = vpack.c.bf16 %v215_v57, %v212_v56  ;;  %v214_v2 = vld [vmem:[#allocation2 + $0x138] sm:$0xff]  ;;  %v949_v3 = vpack.c.bf16 %v210_v61, %v207_v60  ;;  %v213_v5 = vld [vmem:[#allocation2 + $0x130] sm:$0xff]  ;;  %v216_v6 = vld [vmem:[#allocation2 + $0x148] sm:$0xff] }
  0x48   :  { %v927_v4 = vpack.c.bf16 %v214_v2, %v211_v63  ;;  %v952_v7 = vpack.c.bf16 %v216_v6, %v213_v5  ;;  %v218_v8 = vld [vmem:[#allocation2 + $0x158] sm:$0xff]  ;;  %v221_v9 = vld [vmem:[#allocation2 + $0x170] sm:$0xff]  ;;  %v220_v12 = vld [vmem:[#allocation2 + $0x168] sm:$0xff] }
  0x49   :  { %v929_v10 = vpack.c.bf16 %v221_v9, %v218_v8  ;;  %v217_v11 = vld [vmem:[#allocation2 + $0x150] sm:$0xff]  ;;  %v219_v14 = vld [vmem:[#allocation2 + $0x160] sm:$0xff]  ;;  %v222_v15 = vld [vmem:[#allocation2 + $0x178] sm:$0xff] }
  0x4a   :  { %941 = vmatpush3.bf16.msra.mxu0 %v940_v40  ;;  %916 = vmatpush1.bf16.msra.mxu1 %v915_v41  ;;  %v931_v13 = vpack.c.bf16 %v220_v12, %v217_v11  ;;  %v955_v16 = vpack.c.bf16 %v222_v15, %v219_v14  ;;  %v381_v17 = vld [vmem:[#allocation5 + $0x8] sm:$0xff]  ;;  %v384_v18 = vld [vmem:[#allocation5 + $0x20] sm:$0xff]  ;;  %v383_v22 = vld [vmem:[#allocation5 + $0x18] sm:$0xff] }
  0x4b   :  { %942 = vmatprep.subr.bf16.mxu0 %v1188_v0  ;;  %918 = vmatprep.subr.bf16.mxu1 %v917_v44  ;;  %v957_v19 = vpack.c.bf16 %v384_v18, %v381_v17  ;;  %v723_v20 = vld [vmem:[%s1394_s6] ss:$0 sm:$0xff]  ;;  %v382_v23 = vld [vmem:[#allocation5 + $0x10] sm:$0xff]  ;;  %v385_v24 = vld [vmem:[#allocation5 + $0x28] sm:$0xff] }
  0x4c   :  { %v380_v21 = vld [vmem:[#allocation5] sm:$0xff]  ;;  %v387_v26 = vld [vmem:[#allocation5 + $0x38] sm:$0xff]  ;;  %v390_v27 = vld [vmem:[#allocation5 + $0x50] sm:$0xff]  ;;  %v990_v32 = vpack.c.bf16 %v385_v24, %v382_v23 }
  0x4d   :  { %v959_v30 = vpack.c.bf16 %v383_v22, %v380_v21  ;;  %v386_v31 = vld [vmem:[#allocation5 + $0x30] sm:$0xff]  ;;  %v961_v34 = vpack.c.bf16 %v390_v27, %v387_v26  ;;  %v389_v35 = vld [vmem:[#allocation5 + $0x48] sm:$0xff]  ;;  %v388_v36 = vld [vmem:[#allocation5 + $0x40] sm:$0xff] }
  0x4e   :  { %944 = vmatpush3.bf16.msra.mxu0 %v943_v49  ;;  %920 = vmatpush1.bf16.msra.mxu1 %v919_v50  ;;  %v391_v37 = vld [vmem:[#allocation5 + $0x58] sm:$0xff]  ;;  %v393_v38 = vld [vmem:[#allocation5 + $0x68] sm:$0xff]  ;;  %v396_v39 = vld [vmem:[#allocation5 + $0x80] sm:$0xff]  ;;  %v963_v40 = vpack.c.bf16 %v389_v35, %v386_v31 }
  0x4f   :  { %945 = vmatprep.subr.bf16.mxu0 %v1188_v0  ;;  %922 = vmatprep.subr.bf16.mxu1 %v921_v53  ;;  %v392_v41 = vld [vmem:[#allocation5 + $0x60] sm:$0xff]  ;;  %v993_v42 = vpack.c.bf16 %v391_v37, %v388_v36  ;;  %v965_v43 = vpack.c.bf16 %v396_v39, %v393_v38  ;;  %v395_v44 = vld [vmem:[#allocation5 + $0x78] sm:$0xff]  ;;  %v394_v45 = vld [vmem:[#allocation5 + $0x70] sm:$0xff] }
  0x50   :  { %v397_v46 = vld [vmem:[#allocation5 + $0x88] sm:$0xff]  ;;  %v399_v47 = vld [vmem:[#allocation5 + $0x98] sm:$0xff]  ;;  %v402_v48 = vld [vmem:[#allocation5 + $0xb0] sm:$0xff]  ;;  %v967_v49 = vpack.c.bf16 %v395_v44, %v392_v41 }
  0x51   :  { %v398_v50 = vld [vmem:[#allocation5 + $0x90] sm:$0xff]  ;;  %v996_v51 = vpack.c.bf16 %v397_v46, %v394_v45  ;;  %v969_v52 = vpack.c.bf16 %v402_v48, %v399_v47  ;;  %v401_v53 = vld [vmem:[#allocation5 + $0xa8] sm:$0xff]  ;;  %v400_v54 = vld [vmem:[#allocation5 + $0xa0] sm:$0xff] }
  0x52   :  { %947 = vmatpush3.bf16.msra.mxu0 %v946_v58  ;;  %924 = vmatpush1.bf16.msra.mxu1 %v923_v59  ;;  %v403_v55 = vld [vmem:[#allocation5 + $0xb8] sm:$0xff]  ;;  %v405_v56 = vld [vmem:[#allocation5 + $0xc8] sm:$0xff]  ;;  %v408_v57 = vld [vmem:[#allocation5 + $0xe0] sm:$0xff]  ;;  %v971_v58 = vpack.c.bf16 %v401_v53, %v398_v50 }
  0x53   :  { %948 = vmatprep.subr.bf16.mxu0 %v1188_v0  ;;  %926 = vmatprep.subr.bf16.mxu1 %v925_v62  ;;  %v404_v59 = vld [vmem:[#allocation5 + $0xc0] sm:$0xff]  ;;  %v999_v60 = vpack.c.bf16 %v403_v55, %v400_v54  ;;  %v973_v61 = vpack.c.bf16 %v408_v57, %v405_v56  ;;  %v407_v62 = vld [vmem:[#allocation5 + $0xd8] sm:$0xff]  ;;  %v406_v63 = vld [vmem:[#allocation5 + $0xd0] sm:$0xff] }
  0x54   :  { %v409_v2 = vld [vmem:[#allocation5 + $0xe8] sm:$0xff]  ;;  %v975_v5 = vpack.c.bf16 %v407_v62, %v404_v59  ;;  %v410_v6 = vld [vmem:[#allocation5 + $0xf0] sm:$0xff]  ;;  %v415_v11 = vld [vmem:[#allocation5 + $0x118] sm:$0xff] }
  0x55   :  { %v413_v9 = vld [vmem:[#allocation5 + $0x108] sm:$0xff]  ;;  %v416_v15 = vld [vmem:[#allocation5 + $0x120] sm:$0xff]  ;;  %v419_v18 = vld [vmem:[#allocation5 + $0x138] sm:$0xff] }
  0x56   :  { %950 = vmatpush3.bf16.msra.mxu0 %v949_v3  ;;  %928 = vmatpush1.bf16.msra.mxu1 %v927_v4  ;;  %v411_v3 = vld [vmem:[#allocation5 + $0xf8] sm:$0xff]  ;;  %v414_v4 = vld [vmem:[#allocation5 + $0x110] sm:$0xff]  ;;  %v417_v12 = vld [vmem:[#allocation5 + $0x128] sm:$0xff]  ;;  %v979_v14 = vpack.c.bf16 %v413_v9, %v410_v6  ;;  %v983_v23 = vpack.c.bf16 %v419_v18, %v416_v15 }
  0x57   :  { %951 = vmatprep.subr.bf16.mxu0 %v1188_v0  ;;  %930 = vmatprep.subr.bf16.mxu1 %v929_v10  ;;  %v977_v8 = vpack.c.bf16 %v414_v4, %v411_v3  ;;  %v412_v10 = vld [vmem:[#allocation5 + $0x100] sm:$0xff]  ;;  %v423_v21 = vld [vmem:[#allocation5 + $0x158] sm:$0xff]  ;;  %v426_v22 = vld [vmem:[#allocation5 + $0x170] sm:$0xff] }
  0x58   :  { %v422_v24 = vld [vmem:[#allocation5 + $0x150] sm:$0xff]  ;;  %v985_v26 = vpack.c.bf16 %v426_v22, %v423_v21  ;;  %v425_v27 = vld [vmem:[#allocation5 + $0x168] sm:$0xff]  ;;  %v602_v37 = vld [vmem:[#allocation7 + $0x18] sm:$0xff] }
  0x59   :  { %v601_v36 = vld [vmem:[#allocation7 + $0x10] sm:$0xff]  ;;  %v603_v39 = vld [vmem:[#allocation7 + $0x20] sm:$0xff]  ;;  %v608_v45 = vld [vmem:[#allocation7 + $0x48] sm:$0xff] }
  0x5a   :  { %953 = vmatpush3.bf16.msra.mxu0 %v952_v7  ;;  %932 = vmatpush1.bf16.msra.mxu1 %v931_v13  ;;  %v1002_v7 = vpack.c.bf16 %v409_v2, %v406_v63  ;;  %v420_v13 = vld [vmem:[#allocation5 + $0x140] sm:$0xff]  ;;  %v1017_v38 = vpack.c.bf16 %v602_v37, %v601_v36  ;;  %v609_v47 = vld [vmem:[#allocation7 + $0x50] sm:$0xff]  ;;  %v610_v48 = vld [vmem:[#allocation7 + $0x58] sm:$0xff] }
  0x5b   :  { %954 = vmatprep.subr.bf16.mxu0 %v1188_v0  ;;  %958 = vmatprep.subr.bf16.mxu1 %v957_v19  ;;  %v981_v17 = vpack.c.bf16 %v420_v13, %v417_v12  ;;  %v418_v19 = vld [vmem:[#allocation5 + $0x130] sm:$0xff]  ;;  %v607_v44 = vld [vmem:[#allocation7 + $0x40] sm:$0xff]  ;;  %v614_v54 = vld [vmem:[#allocation7 + $0x78] sm:$0xff] }
  0x5c   :  { %v1026_v46 = vpack.c.bf16 %v608_v45, %v607_v44  ;;  %v611_v50 = vld [vmem:[#allocation7 + $0x60] sm:$0xff]  ;;  %v613_v53 = vld [vmem:[#allocation7 + $0x70] sm:$0xff] }
  0x5d   :  { %v1035_v55 = vpack.c.bf16 %v614_v54, %v613_v53 }
  0x5e   :  { %956 = vmatpush3.bf16.msra.mxu0 %v955_v16  ;;  %v1005_v16 = vpack.c.bf16 %v415_v11, %v412_v10 }
  0x5f   :  { %989 = vmatprep.subr.bf16.mxu0 %v1188_v0 }
 0x114   :  { %v170_v25 = vpop.f32.mrb[0].mxu0 }
 0x115   :  { %v171_v28 = vadd.f32 %v723_v20, %v170_v25  ;;  %v792_v29 = vpop.f32.mrb[1].mxu0  ;;  %v421_v20 = vld [vmem:[#allocation5 + $0x148] sm:$0xff] }
 0x116   :  { %v1008_v25 = vpack.c.bf16 %v421_v20, %v418_v19  ;;  %v427_v29 = vld [vmem:[#allocation5 + $0x178] sm:$0xff] }
 0x117   :  { %v174_v33 = vmax.f32 %v171_v28, 0.0  ;;  %v424_v28 = vld [vmem:[#allocation5 + $0x160] sm:$0xff] }
 0x118   :  { %v1011_v31 = vpack.c.bf16 %v427_v29, %v424_v28 }
 0x119   :  { %304 = vmatmul.mubr.f32.vlgmr.msra.gmra.mrb[0].mxu1 %v174_v33  ;;  %826 = vmatmul.mubr.f32.vlgmr.msra.gmra.mrb[2].mxu0 %v174_v33  ;;  %v599_v33 = vld [vmem:[#allocation7] sm:$0xff] }
 0x11a   :  { %960 = vmatpush1.bf16.msra.mxu1 %v959_v30  ;;  %991 = vmatpush3.bf16.msra.mxu0 %v990_v32  ;;  %v987_v30 = vpack.c.bf16 %v425_v27, %v422_v24  ;;  %v1340_v32 = vld [vmem:[%s1389_s1] sm:$0xff] }
 0x11b   :  { %962 = vmatprep.subr.bf16.mxu1 %v961_v34  ;;  %992 = vmatprep.subr.bf16.mxu0 %v1188_v0  ;;  %v600_v34 = vld [vmem:[#allocation7 + $0x8] sm:$0xff] }
 0x11c   :  { %493 = vmatprep.mubr.f32.mxu1 %v1190_v1  ;;  %860 = vmatprep.mubr.msk.f32.mxu0 %vm1189_vm0, %v1190_v1  ;;  %v1014_v35 = vpack.c.bf16 %v600_v34, %v599_v33 }
 0x11e   :  { %964 = vmatpush1.bf16.msra.mxu1 %v963_v40  ;;  %994 = vmatpush3.bf16.msra.mxu0 %v993_v42  ;;  %v604_v40 = vld [vmem:[#allocation7 + $0x28] sm:$0xff]  ;;  %v605_v42 = vld [vmem:[#allocation7 + $0x30] sm:$0xff] }
 0x11f   :  { %966 = vmatprep.subr.bf16.mxu1 %v965_v43  ;;  %995 = vmatprep.subr.bf16.mxu0 %v1188_v0  ;;  %v1020_v41 = vpack.c.bf16 %v604_v40, %v603_v39 }
 0x122   :  { %968 = vmatpush1.bf16.msra.mxu1 %v967_v49  ;;  %997 = vmatpush3.bf16.msra.mxu0 %v996_v51  ;;  %v1029_v49 = vpack.c.bf16 %v610_v48, %v609_v47  ;;  %v612_v51 = vld [vmem:[#allocation7 + $0x68] sm:$0xff] }
 0x123   :  { %970 = vmatprep.subr.bf16.mxu1 %v969_v52  ;;  %998 = vmatprep.subr.bf16.mxu0 %v1188_v0  ;;  %v1032_v52 = vpack.c.bf16 %v612_v51, %v611_v50 }
 0x126   :  { %972 = vmatpush1.bf16.msra.mxu1 %v971_v58  ;;  %1000 = vmatpush3.bf16.msra.mxu0 %v999_v60  ;;  %v224_v58 = vlaneseq }
 0x127   :  { %974 = vmatprep.subr.bf16.mxu1 %v973_v61  ;;  %1001 = vmatprep.subr.bf16.mxu0 %v1188_v0  ;;  %v87_v61 = vld [vmem:[%s1395_s7] sm:$0x7] }
 0x128   :  { %v225_v59 = vshrl.u32 %v224_v58, 7 }
 0x12a   :  { %976 = vmatpush1.bf16.msra.mxu1 %v975_v5  ;;  %1003 = vmatpush3.bf16.msra.mxu0 %v1002_v7  ;;  %v226_v60 = vsub.s32 0, %v225_v59  ;;  %v230_v62 = vsub.s32 1, %v225_v59  ;;  %v234_v12 = vsub.s32 2, %v225_v59 }
 0x12b   :  { %978 = vmatprep.subr.bf16.mxu1 %v977_v8  ;;  %1004 = vmatprep.subr.bf16.mxu0 %v1188_v0 }
 0x12c   :  { %v227_v63 = vrot.slane %v87_v61, %v226_v60  ;;  %v231_v3 = vrot.slane %v87_v61, %v230_v62  ;;  %v235_v15 = vrot.slane %v87_v61, %v234_v12 }
 0x12e   :  { %980 = vmatpush1.bf16.msra.mxu1 %v979_v14  ;;  %1006 = vmatpush3.bf16.msra.mxu0 %v1005_v16  ;;  %v727_v14 = vld [vmem:[%s1396_s8] ss:$0 sm:$0xff]  ;;  %s709_s8 = sshll.u32 %s1191_s27, 4  ;;  %s710_s8 = int_to_ptr.vmem [resolvable:$true] %s709_s8 }
 0x12f   :  { %982 = vmatprep.subr.bf16.mxu1 %v981_v17  ;;  %1007 = vmatprep.subr.bf16.mxu0 %v1188_v0  ;;  %s1129_s28 = scalar_lea.vmem %s710_s8, 128  ;;  %p1134_p11 = scmp.lt.s32.totalorder %s710_s8, %s710_s8 }
 0x130   :  { %p1130_p10 = scmp.ne.s32.totalorder %s710_s8, %s1129_s28  ;;  %p1135_p12 = scmp.lt.s32.totalorder %s1129_s28, %s1129_s28 }
 0x132   :  { %984 = vmatpush1.bf16.msra.mxu1 %v983_v23  ;;  %1009 = vmatpush3.bf16.msra.mxu0 %v1008_v25  ;;  %p1136_p13 = por %p1135_p12, %p1134_p11 }
 0x133   :  { %986 = vmatprep.subr.bf16.mxu1 %v985_v26  ;;  %1010 = vmatprep.subr.bf16.mxu0 %v1188_v0 }
 0x134   :  { %p1137_p0 = pnand %p1136_p13, %p1130_p10 }
 0x136   :  { %988 = vmatpush1.bf16.msra.mxu1 %v987_v30  ;;  %1012 = vmatpush3.bf16.msra.mxu0 %v1011_v31 }
 0x137   :  { %1013 = vmatprep.subr.bf16.mxu1 %v1188_v0 }
 0x139   :  { %494 = vmatmul.mubr.f32.vlgmr.msra.gmra.mrb[0].mxu1 %v1340_v32  ;;  %861 = vmatmul.mubr.f32.vlgmr.msra.gmra.mrb[4].mxu0 %v1340_v32 }
 0x13a   :  { %895 = vmatprep.mubr.msk.f32.mxu1 %vm1189_vm0, %v1190_v1  ;;  %1015 = vmatpush3.bf16.msra.mxu1 %v1014_v35  ;;  %v606_v1 = vld [vmem:[#allocation7 + $0x38] sm:$0xff] }
 0x13b   :  { %1016 = vmatprep.subr.bf16.mxu1 %v1188_v0  ;;  %v1023_v43 = vpack.c.bf16 %v606_v1, %v605_v42 }
 0x13e   :  { %1018 = vmatpush3.bf16.msra.mxu1 %v1017_v38 }
 0x13f   :  { %1019 = vmatprep.subr.bf16.mxu1 %v1188_v0 }
 0x142   :  { %1021 = vmatpush3.bf16.msra.mxu1 %v1020_v41 }
 0x143   :  { %1022 = vmatprep.subr.bf16.mxu1 %v1188_v0 }
 0x146   :  { %1024 = vmatpush3.bf16.msra.mxu1 %v1023_v43 }
 0x147   :  { %1025 = vmatprep.subr.bf16.mxu1 %v1188_v0 }
 0x14a   :  { %1027 = vmatpush3.bf16.msra.mxu1 %v1026_v46 }
 0x14b   :  { %1028 = vmatprep.subr.bf16.mxu1 %v1188_v0 }
 0x14e   :  { %1030 = vmatpush3.bf16.msra.mxu1 %v1029_v49 }
 0x14f   :  { %1031 = vmatprep.subr.bf16.mxu1 %v1188_v0 }
 0x152   :  { %1033 = vmatpush3.bf16.msra.mxu1 %v1032_v52 }
 0x153   :  { %1034 = vmatprep.subr.bf16.mxu1 %v1188_v0 }
 0x156   :  { %1036 = vmatpush3.bf16.msra.mxu1 %v1035_v55 }
 0x1ec   :  { %v376_v56 = vpop.f32.mrb[2].mxu0 }
 0x1ed   :  { %v827_v57 = vpop.f32.mrb[3].mxu0  ;;  %v377_v19 = vadd.f32 %v376_v56, %v235_v15 }
 0x20c   :  { %v495_v2 = vpop.f32.mrb[0].mxu1  ;;  %v566_v4 = vpop.f32.mrb[4].mxu0 }
 0x20d   :  { %v1037_v5 = vadd.f32 %v495_v2, %v227_v63  ;;  %v497_v6 = vpop.f32.mrb[1].mxu1  ;;  %v862_v7 = vpop.f32.mrb[5].mxu0  ;;  %v590_v17 = vadd.f32 %v727_v14, %v566_v4 }
 0x20e   :  { %v1038_v0 = vadd.f32 %v497_v6, %v231_v3 }
 0x20f   :  { %v725_v8 = vmul.f32 -1.442695, %v1037_v5 }
 0x210   :  { %v726_v9 = vmul.f32 -1.442695, %v1038_v0 }
 0x211   :  { %1053 = vpow2.f32 %v725_v8 }
 0x212   :  { %1055 = vpow2.f32 %v726_v9 }
 0x21b   :  { %v1054_v10 = vpop.eup %1053 }
 0x21c   :  { %v578_v11 = vadd.f32 1.0, %v1054_v10  ;;  %v1056_v13 = vpop.eup %1055 }
 0x21d   :  { %v579_v16 = vadd.f32 1.0, %v1056_v13 }
 0x21e   :  { %1057 = vrcp.f32 %v578_v11 }
 0x21f   :  { %1059 = vrcp.f32 %v579_v16 }
 0x228   :  { %v1058_v18 = vpop.eup %1057 }
 0x229   :  { %v591_v20 = vmul.f32 %v1058_v18, %v590_v17  ;;  %v1060_v22 = vpop.eup %1059 }
 0x22a   :  { %v594_v23 = vsub.f32 1.0, %v1060_v22  ;;  %v596_v26 = vmul.f32 %v1060_v22, %v1340_v32 }
 0x22b   :  { %v592_v21 = vadd.f32 %v591_v20, %v377_v19 }
 0x22d   :  { %1061 = vtanh.f32 %v592_v21 }
 0x237   :  { %v1062_v24 = vpop.eup %1061 }
 0x238   :  { %v595_v25 = vmul.f32 %v1062_v24, %v594_v23 }
 0x23a   :  { %v597_v27 = vadd.f32 %v596_v26, %v595_v25 }
 0x23c   :  { %896 = vmatmul.mubr.f32.vlgmr.msra.gmra.mrb[2].mxu1 %v597_v27  ;;  %598 = vst [vmem:[#allocation9] sm:$0xff] %v597_v27 }
 0x23d   :  { %1140 = shalt.err (!%p1137_p0)
}
 0x23e   :  { %s1141_s14 = scalar_lea.hbm %s1399_s11, 128 }
 0x23f   :  { %p1142_p1 = scmp.ne.s32.totalorder %s1399_s11, %s1141_s14  ;;  %p1145_p2 = scmp.lt.u32.totalorder %s1141_s14, %s1399_s11 }
 0x241   :  { %p1147_p3 = pnand %p1145_p2, %p1142_p1 }
 0x243   :  { %1150 = shalt.err (!%p1147_p3)
}
 0x244   :  { %712 = dma.vmem_to_hbm [thread:$0]  %s710_s8, 128, %s1399_s11, [#allocation10]   ;;  %v728_v28 = vld [vmem:[%s1397_s9] ss:$0 sm:$0xff] }
 0x245   :  { %s1192_s21 = smov [#allocation8]  }
 0x246   :  { %s699_s5 = sshll.u32 %s1192_s21, 4  ;;  %s700_s5 = int_to_ptr.vmem [resolvable:$true] %s699_s5 }
 0x247   :  { %s1151_s22 = scalar_lea.vmem %s700_s5, 128  ;;  %p1156_p5 = scmp.lt.s32.totalorder %s700_s5, %s700_s5 }
 0x248   :  { %p1152_p4 = scmp.ne.s32.totalorder %s700_s5, %s1151_s22  ;;  %p1157_p6 = scmp.lt.s32.totalorder %s1151_s22, %s1151_s22 }
 0x24a   :  { %p1158_p7 = por %p1157_p6, %p1156_p5 }
 0x24c   :  { %p1159_p8 = pnand %p1158_p7, %p1152_p4 }
 0x30f   :  { %v687_v29 = vpop.f32.mrb[2].mxu1 }
 0x310   :  { %v688_v30 = vadd.f32 %v728_v28, %v687_v29  ;;  %v897_v31 = vpop.f32.mrb[3].mxu1 }
 0x312   :  { %v691_v32 = vmax.f32 %v688_v30, 0.0 }
 0x314   :  { %692 = vst [vmem:[#allocation8] sm:$0xff] %v691_v32 }
 0x315   :  { %1162 = shalt.err (!%p1159_p8)
}
 0x316   :  { %s1163_s4 = scalar_lea.hbm %s1398_s10, 128 }
 0x317   :  { %p1164_p9 = scmp.ne.s32.totalorder %s1398_s10, %s1163_s4  ;;  %p1167_p10 = scmp.lt.u32.totalorder %s1163_s4, %s1398_s10 }
 0x319   :  { %p1169_p11 = pnand %p1167_p10, %p1164_p9 }
 0x31b   :  { %1172 = shalt.err (!%p1169_p11)
}
 0x31c   :  { %702 = dma.vmem_to_hbm [thread:$0]  %s700_s5, 128, %s1398_s10, [#allocation4]  }
 0x31d   :  { %1177 = dma.done.wait [#allocation4], 128  }
 0x31e   :  { %1178 = vsyncadd [#allocation4], 4294967168 }
 0x31f   :  { %1179 = dma.done.wait [#allocation10], 128  }
 0x320   :  { %1180 = vsyncadd [#allocation10], 4294967168 }
 0x321   :  { %719 = vsyncpa [#allocation3], 1 }
 0x322   :  { %720 = vsyncpa [#allocation6], 1 }
 0x323   :  { %721 = vsyncpa [#allocation4], 1 }
 0x324   :  { %722 = vsyncpa [#allocation10], 1 }

</bundles_post_ra>
